<compile_context>
chip_gen: v7x
topology: tpu7x:2x2x1
jax: 0.10.0
libtpu: 0.0.40
codegen_flags: <defaults>
</compile_context>

<pallas_src>
import numpy as np

import jax
import jax.numpy as jnp
from jax import lax
from jax.experimental import pallas as pl
from jax.experimental.pallas import tpu as pltpu  # noqa: F401  (CompilerParams hook for scaling)

_LANES = 128


def _round_up(x: int, m: int) -> int:
    return (x + m - 1) // m * m


# --------------------------------------------------------------------------- #
# Kernel: one invocation processes the whole batch.
# --------------------------------------------------------------------------- #
def _self_attention_kernel(
    x_ref,          # (Np, D)        f32   flattened + row-padded batch of inputs
    wqkv_ref,       # (D, 3*Hp)      f32   fused Q|K|V weights, 128-lane padded sections
    bqkv_ref,       # (1, 3*Hp)      f32   fused Q|K|V bias (padding columns zero)
    ws_rep_ref,     # (B*G, Np)      f32   block-diag calculate_scores weight, G-repeated
    mask_bias_ref,  # (B*G, Np)      f32   +bs valid | -1e38 masked | -inf cross-batch/pad
    agg_ref,        # out (B*G, Hp)  f32   aggregation (columns >= H are padding)
    attn_ref,       # out (B*G, Np)  f32   attention weights (block-diagonal layout)
):
    Hp = agg_ref.shape[1]

    # Fused Q|K|V projection: single (Np, D) @ (D, 3*Hp) MXU pass, f32 accumulation.
    qkv = jnp.dot(x_ref[...], wqkv_ref[...],
                  preferred_element_type=jnp.float32) + bqkv_ref[...]
    # 128-lane-aligned slices -> no lane rotates / relayouts.
    q = qkv[:, 0:Hp]
    k = qkv[:, Hp:2 * Hp]
    v = qkv[:, 2 * Hp:3 * Hp]

    # kw[b*G+g] = ws @ k_b  (ws_rep is block-diagonal and already repeated over G).
    kw = jnp.dot(ws_rep_ref[...], k, preferred_element_type=jnp.float32)   # (B*G, Hp)

    # scores[b*G+g, b'*N+i] = kw[b*G+g] . q[b'*N+i]; the additive mask keeps only
    # own-batch entries: +bs where the element belongs to the group, -1e38 where
    # it does not (fully-masked groups -> constant row == uniform softmax, matching
    # the torch fix-up), -inf for cross-batch / lane-padding columns (zero weight).
    scores = lax.dot_general(kw, q, (((1,), (1,)), ((), ())),
                             preferred_element_type=jnp.float32)           # (B*G, Np)
    scores = scores + mask_bias_ref[...]

    # Row softmax (max-shifted); reciprocal runs on the EUP slot.
    m = jnp.max(scores, axis=1, keepdims=True)
    e = jnp.exp(scores - m)
    denom = jnp.sum(e, axis=1, keepdims=True)
    w = e * pl.reciprocal(denom, approx=True)

    attn_ref[...] = w
    agg_ref[...] = jnp.dot(w, v, preferred_element_type=jnp.float32)


# --------------------------------------------------------------------------- #
# One-time parameter packing (hoisted out of the per-call hot path).
# --------------------------------------------------------------------------- #
def pack_self_attention_params(params, *, num_elem, num_groups, batch):
    wq, wk, wv = params["wq"], params["wk"], params["wv"]
    bq, bk, bv = params["bq"], params["bk"], params["bv"]
    ws = params["ws"].reshape(-1).astype(jnp.float32)          # (N,)
    bs = params["bs"].reshape(()).astype(jnp.float32)          # scalar

    H, D = wq.shape
    N, G, B = int(num_elem), int(num_groups), int(batch)
    assert ws.shape[0] == N
    Hp = _round_up(H, _LANES)
    Np = _round_up(B * N, _LANES)

    # Fused Q|K|V weight / bias, each section padded to a 128-lane boundary.
    wqkv = jnp.zeros((D, 3 * Hp), jnp.float32)
    wqkv = wqkv.at[:, 0:H].set(wq.T.astype(jnp.float32))
    wqkv = wqkv.at[:, Hp:Hp + H].set(wk.T.astype(jnp.float32))
    wqkv = wqkv.at[:, 2 * Hp:2 * Hp + H].set(wv.T.astype(jnp.float32))
    bqkv = jnp.zeros((1, 3 * Hp), jnp.float32)
    bqkv = bqkv.at[0, 0:H].set(bq.astype(jnp.float32))
    bqkv = bqkv.at[0, Hp:Hp + H].set(bk.astype(jnp.float32))
    bqkv = bqkv.at[0, 2 * Hp:2 * Hp + H].set(bv.astype(jnp.float32))

    # Block-diagonal calculate_scores weight, repeated over the G groups:
    # ws_rep[b*G + g, b*N + i] = ws[i]; zero elsewhere (including lane padding).
    eye = jnp.eye(B, dtype=jnp.float32)
    ws4 = eye[:, None, :, None] * ws[None, None, None, :]                 # (B,1,B,N)
    ws_rep = jnp.broadcast_to(ws4, (B, G, B, N)).reshape(B * G, B * N)
    if Np > B * N:
        ws_rep = jnp.concatenate(
            [ws_rep, jnp.zeros((B * G, Np - B * N), jnp.float32)], axis=1)

    dims = dict(B=B, N=N, G=G, D=D, H=H, Hp=Hp, Np=Np)
    return dict(wqkv=wqkv, bqkv=bqkv, ws_rep=ws_rep, bs=bs, dims=dims)


# --------------------------------------------------------------------------- #
# Forward wrapper.
# --------------------------------------------------------------------------- #
def self_attention_pallas(x, mask, packed):
    """SelfAttention forward in one Pallas call.

    x:    (N, D) or (B, N, D) float32
    mask: (N, G) or (B, N, G) 0/1 group-membership mask
    packed: output of pack_self_attention_params (batch must match).
    Returns (aggregation, attention_weights):
      (G, H), (G, N)         for 2-D input
      (B, G, H), (B, G, N)   for 3-D input
    """
    d = packed["dims"]
    B, N, G, D, H, Hp, Np = d["B"], d["N"], d["G"], d["D"], d["H"], d["Hp"], d["Np"]

    single = (x.ndim == 2)
    if single:
        x = x[None]
        mask = mask[None]
    assert x.shape == (B, N, D), (x.shape, (B, N, D))
    assert mask.shape == (B, N, G), (mask.shape, (B, N, G))

    # Flatten the batch into rows and pad to the lane-dense row count Np.
    x_flat = x.reshape(B * N, D).astype(jnp.float32)
    if Np > B * N:
        x_flat = jnp.concatenate(
            [x_flat, jnp.zeros((Np - B * N, D), jnp.float32)], axis=0)

    # Additive score bias (per call; mask is a runtime input; hoist it too if
    # the mask is static across calls).
    neg_inf = jnp.float32(-jnp.inf)
    big_neg = jnp.float32(-1e38)
    valid = jnp.swapaxes(mask, -1, -2) != 0                               # (B, G, N)
    own = jnp.where(valid, packed["bs"], big_neg)                         # (B, G, N)
    blk = jnp.where(jnp.eye(B, dtype=bool)[:, None, :, None],
                    own[:, :, None, :], neg_inf)                          # (B, G, B, N)
    mask_bias = blk.reshape(B * G, B * N)
    if Np > B * N:
        mask_bias = jnp.concatenate(
            [mask_bias, jnp.full((B * G, Np - B * N), neg_inf, jnp.float32)],
            axis=1)

    # Single grid step: at these shapes the whole batch is a handful of vregs, so
    # one invocation minimizes the fixed per-step pipeline cost.
    # TODO(synk): on v7x (2 TensorCores) split the batch over grid=(2,) with
    # dimension_semantics=("parallel",); for large N add an N-tiling grid axis and
    # set pltpu.CompilerParams(vmem_limit_bytes=...) (v7x has 64 MiB VMEM).
    agg_p, attn_p = pl.pallas_call(
        _self_attention_kernel,
        grid=(1,),
        in_specs=[
            pl.BlockSpec((Np, D), lambda i: (0, 0)),           # x (flattened + padded)
            pl.BlockSpec((D, 3 * Hp), lambda i: (0, 0)),       # fused QKV weight
            pl.BlockSpec((1, 3 * Hp), lambda i: (0, 0)),       # fused QKV bias
            pl.BlockSpec((B * G, Np), lambda i: (0, 0)),       # block-diag ws (G-repeated)
            pl.BlockSpec((B * G, Np), lambda i: (0, 0)),       # additive mask bias
        ],
        out_specs=(
            pl.BlockSpec((B * G, Hp), lambda i: (0, 0)),       # aggregation (lane-dense)
            pl.BlockSpec((B * G, Np), lambda i: (0, 0)),       # attention weights (lane-dense)
        ),
        out_shape=(
            jax.ShapeDtypeStruct((B * G, Hp), jnp.float32),
            jax.ShapeDtypeStruct((B * G, Np), jnp.float32),
        ),
    )(x_flat, packed["wqkv"], packed["bqkv"], packed["ws_rep"], mask_bias)

    # Strip lane padding / extract per-batch diagonal blocks (free XLA glue).
    agg = agg_p[:, :H].reshape(B, G, H)
    attn = attn_p[:, :B * N].reshape(B, G, B, N)[jnp.arange(B), :, jnp.arange(B), :]

    if single:
        agg, attn = agg[0], attn[0]
    return agg, attn


# --------------------------------------------------------------------------- #
# Pure-JAX reference + init (mirrors the PyTorch forward exactly).
# --------------------------------------------------------------------------- #
def _reference_single(x, mask, num_groups, params):
    q = x @ params["wq"].T + params["bq"]
    k = x @ params["wk"].T + params["bk"]
    v = x @ params["wv"].T + params["bv"]
    s = q @ k.T
    sc = s @ params["ws"].reshape(1, -1).T + params["bs"]                  # (N, 1)
    scores = jnp.broadcast_to(sc.reshape(1, -1), (num_groups, x.shape[0]))
    maskT = (mask == 0).T
    scores = jnp.where(maskT, -jnp.inf, scores)
    row_all_inf = jnp.all(scores == -jnp.inf, axis=1, keepdims=True)
    scores = jnp.where(row_all_inf, -1e38, scores)
    w = jax.nn.softmax(scores, axis=1)
    return w @ v, w


def _init_params(key, input_size, hidden_size, num_elem):
    """Deterministic nn.Linear-style init: U(-1/sqrt(fan_in), 1/sqrt(fan_in))."""
    keys = jax.random.split(key, 8)

    def lin(kw, kb, out_f, in_f):
        bound = 1.0 / np.sqrt(in_f)
        w = jax.random.uniform(kw, (out_f, in_f), jnp.float32, -bound, bound)
        b = jax.random.uniform(kb, (out_f,), jnp.float32, -bound, bound)
        return w, b

    wq, bq = lin(keys[0], keys[1], hidden_size, input_size)
    wk, bk = lin(keys[2], keys[3], hidden_size, input_size)
    wv, bv = lin(keys[4], keys[5], hidden_size, input_size)
    ws, bs = lin(keys[6], keys[7], 1, num_elem)
    # NOTE: final_out (hidden_size -> input_size) is defined in the torch module
    # but never used in forward(), so it is not part of the kernel.
    return dict(wq=wq, bq=bq, wk=wk, bk=bk, wv=wv, bv=bv, ws=ws, bs=bs)


if __name__ == "__main__":
    input_size = 32
    hidden_size = 32
    num_elem = 8
    num_groups = 4
    batch = 4

    key = jax.random.PRNGKey(0)
    k_x, k_p, k_m = jax.random.split(key, 3)

    xb = jax.random.normal(k_x, (batch, num_elem, input_size), jnp.float32)
    params = _init_params(k_p, input_size, hidden_size, num_elem)

    # Deterministic 0/1 membership masks; instance 0 has one fully-empty group
    # to exercise the "all -inf row -> -1e38 -> uniform softmax" branch.
    mask_np = np.asarray(
        (jax.random.uniform(k_m, (batch, num_elem, num_groups)) > 0.4)
    ).astype(np.float32)
    mask_np[0, :, -1] = 0.0
    mask_np[:, 0, 0] = 1.0  # at least one non-empty group everywhere
    maskb = jnp.asarray(mask_np, jnp.float32)

    # --- batched path: one kernel invocation for the whole batch ------------
    packed_b = pack_self_attention_params(
        params, num_elem=num_elem, num_groups=num_groups, batch=batch)
    aggb, attnb = self_attention_pallas(xb, maskb, packed_b)
    aggb = jax.block_until_ready(aggb)
    attnb = jax.block_until_ready(attnb)
    for b in range(batch):
        a_r, w_r = _reference_single(xb[b], maskb[b], num_groups, params)
        np.testing.assert_allclose(np.asarray(attnb[b]), np.asarray(w_r),
                                   rtol=5e-3, atol=5e-3)
        np.testing.assert_allclose(np.asarray(aggb[b]), np.asarray(a_r),
                                   rtol=5e-3, atol=5e-3)

    # --- single-instance path (matches the torch module call signature) -----
    packed_1 = pack_self_attention_params(
        params, num_elem=num_elem, num_groups=num_groups, batch=1)
    agg, attn = self_attention_pallas(xb[0], maskb[0], packed_1)
    agg = jax.block_until_ready(agg)
    attn = jax.block_until_ready(attn)
    agg_ref, attn_ref = _reference_single(xb[0], maskb[0], num_groups, params)
    np.testing.assert_allclose(np.asarray(attn), np.asarray(attn_ref),
                               rtol=5e-3, atol=5e-3)
    np.testing.assert_allclose(np.asarray(agg), np.asarray(agg_ref),
                               rtol=5e-3, atol=5e-3)

    print("KERNEL_OK")
</pallas_src>

<mosaic_0001>
module attributes {stable_mosaic.version = 11 : i64} {
  func.func @_self_attention_kernel(%arg0: i32, %arg1: memref<128x32xf32, #tpu.memory_space<vmem>>, %arg2: memref<32x384xf32, #tpu.memory_space<vmem>>, %arg3: memref<1x384xf32, #tpu.memory_space<vmem>>, %arg4: memref<16x128xf32, #tpu.memory_space<vmem>>, %arg5: memref<16x128xf32, #tpu.memory_space<vmem>>, %arg6: memref<16x128xf32, #tpu.memory_space<vmem>>, %arg7: memref<16x128xf32, #tpu.memory_space<vmem>>) attributes {dimension_semantics = [#tpu.dimension_semantics<arbitrary>], iteration_bounds = array<i64: 1>, scalar_prefetch = 0 : i64, scratch_operands = 0 : i64, tpu.core_type = #tpu.core_type<tc>, window_params = [{pipeline_mode = #tpu.pipeline_mode<synchronous>, transform_indices = @transform_0, window_bounds = array<i64: 128, 32>}, {pipeline_mode = #tpu.pipeline_mode<synchronous>, transform_indices = @transform_1, window_bounds = array<i64: 32, 384>}, {pipeline_mode = #tpu.pipeline_mode<synchronous>, transform_indices = @transform_2, window_bounds = array<i64: 1, 384>}, {pipeline_mode = #tpu.pipeline_mode<synchronous>, transform_indices = @transform_3, window_bounds = array<i64: 16, 128>}, {pipeline_mode = #tpu.pipeline_mode<synchronous>, transform_indices = @transform_4, window_bounds = array<i64: 16, 128>}, {pipeline_mode = #tpu.pipeline_mode<synchronous>, transform_indices = @transform_5, window_bounds = array<i64: 16, 128>}, {pipeline_mode = #tpu.pipeline_mode<synchronous>, transform_indices = @transform_6, window_bounds = array<i64: 16, 128>}]} {
    %c0 = arith.constant 0 : index
    %c0_0 = arith.constant 0 : index
    %0 = vector.load %arg1[%c0, %c0_0] : memref<128x32xf32, #tpu.memory_space<vmem>>, vector<128x32xf32>
    %c0_1 = arith.constant 0 : index
    %c0_2 = arith.constant 0 : index
    %1 = vector.load %arg2[%c0_1, %c0_2] : memref<32x384xf32, #tpu.memory_space<vmem>>, vector<32x384xf32>
    %cst = arith.constant dense<0.000000e+00> : vector<128x384xf32>
    %2 = tpu.matmul %0, %1, %cst {dimension_numbers = #tpu.dot_dimension_numbers<[1], [0], [0], [1], [0, 0, 1, 1], [], []>} : vector<128x32xf32>, vector<32x384xf32>, vector<128x384xf32> -> vector<128x384xf32>
    %c0_3 = arith.constant 0 : index
    %c0_4 = arith.constant 0 : index
    %3 = vector.load %arg3[%c0_3, %c0_4] : memref<1x384xf32, #tpu.memory_space<vmem>>, vector<1x384xf32>
    %4 = vector.broadcast %3 : vector<1x384xf32> to vector<128x384xf32>
    %5 = arith.addf %2, %4 : vector<128x384xf32>
    %6 = vector.extract_strided_slice %5 {offsets = [0, 0], sizes = [128, 128], strides = [1, 1]} : vector<128x384xf32> to vector<128x128xf32>
    %7 = vector.extract_strided_slice %5 {offsets = [0, 128], sizes = [128, 128], strides = [1, 1]} : vector<128x384xf32> to vector<128x128xf32>
    %8 = vector.extract_strided_slice %5 {offsets = [0, 256], sizes = [128, 128], strides = [1, 1]} : vector<128x384xf32> to vector<128x128xf32>
    %c0_5 = arith.constant 0 : index
    %c0_6 = arith.constant 0 : index
    %9 = vector.load %arg4[%c0_5, %c0_6] : memref<16x128xf32, #tpu.memory_space<vmem>>, vector<16x128xf32>
    %cst_7 = arith.constant dense<0.000000e+00> : vector<16x128xf32>
    %10 = tpu.matmul %9, %7, %cst_7 {dimension_numbers = #tpu.dot_dimension_numbers<[1], [0], [0], [1], [0, 0, 1, 1], [], []>} : vector<16x128xf32>, vector<128x128xf32>, vector<16x128xf32> -> vector<16x128xf32>
    %cst_8 = arith.constant dense<0.000000e+00> : vector<16x128xf32>
    %11 = tpu.matmul %10, %6, %cst_8 {dimension_numbers = #tpu.dot_dimension_numbers<[1], [1], [0], [0], [0, 0, 1, 0], [], []>} : vector<16x128xf32>, vector<128x128xf32>, vector<16x128xf32> -> vector<16x128xf32>
    %c0_9 = arith.constant 0 : index
    %c0_10 = arith.constant 0 : index
    %12 = vector.load %arg5[%c0_9, %c0_10] : memref<16x128xf32, #tpu.memory_space<vmem>>, vector<16x128xf32>
    %13 = arith.addf %11, %12 : vector<16x128xf32>
    %cst_11 = arith.constant dense<0xFF800000> : vector<16xf32>
    %14 = vector.multi_reduction <maximumf>, %13, %cst_11 [1] : vector<16x128xf32> to vector<16xf32>
    %15 = vector.shape_cast %14 : vector<16xf32> to vector<16x1xf32>
    %16 = vector.broadcast %15 : vector<16x1xf32> to vector<16x128xf32>
    %17 = arith.subf %13, %16 : vector<16x128xf32>
    %18 = math.exp %17 : vector<16x128xf32>
    %cst_12 = arith.constant dense<0.000000e+00> : vector<16xf32>
    %19 = vector.multi_reduction <add>, %18, %cst_12 [1] : vector<16x128xf32> to vector<16xf32>
    %20 = vector.shape_cast %19 : vector<16xf32> to vector<16x1xf32>
    %21 = tpu.reciprocal %20 {approx = true} : vector<16x1xf32> -> vector<16x1xf32>
    %22 = vector.broadcast %21 : vector<16x1xf32> to vector<16x128xf32>
    %23 = arith.mulf %18, %22 : vector<16x128xf32>
    %c0_13 = arith.constant 0 : index
    %c0_14 = arith.constant 0 : index
    %24 = vector.load %arg7[%c0_13, %c0_14] : memref<16x128xf32, #tpu.memory_space<vmem>>, vector<16x128xf32>
    tpu.vector_store %arg7[%c0_13, %c0_14], %23 {strides = array<i32>} : memref<16x128xf32, #tpu.memory_space<vmem>>, vector<16x128xf32>,
    %cst_15 = arith.constant dense<0.000000e+00> : vector<16x128xf32>
    %25 = tpu.matmul %23, %8, %cst_15 {dimension_numbers = #tpu.dot_dimension_numbers<[1], [0], [0], [1], [0, 0, 1, 1], [], []>} : vector<16x128xf32>, vector<128x128xf32>, vector<16x128xf32> -> vector<16x128xf32>
    %c0_16 = arith.constant 0 : index
    %c0_17 = arith.constant 0 : index
    %26 = vector.load %arg6[%c0_16, %c0_17] : memref<16x128xf32, #tpu.memory_space<vmem>>, vector<16x128xf32>
    tpu.vector_store %arg6[%c0_16, %c0_17], %25 {strides = array<i32>} : memref<16x128xf32, #tpu.memory_space<vmem>>, vector<16x128xf32>,
    return
  }
  func.func @transform_0(%arg0: i32) -> (i32, i32) {
    %c0_i32 = arith.constant 0 : i32
    %c0_i32_0 = arith.constant 0 : i32
    %c0_i32_1 = arith.constant 0 : i32
    return %c0_i32, %c0_i32_0 : i32, i32
  }
  func.func @transform_1(%arg0: i32) -> (i32, i32) {
    %c0_i32 = arith.constant 0 : i32
    %c0_i32_0 = arith.constant 0 : i32
    %c0_i32_1 = arith.constant 0 : i32
    return %c0_i32, %c0_i32_0 : i32, i32
  }
  func.func @transform_2(%arg0: i32) -> (i32, i32) {
    %c0_i32 = arith.constant 0 : i32
    %c0_i32_0 = arith.constant 0 : i32
    %c0_i32_1 = arith.constant 0 : i32
    return %c0_i32, %c0_i32_0 : i32, i32
  }
  func.func @transform_3(%arg0: i32) -> (i32, i32) {
    %c0_i32 = arith.constant 0 : i32
    %c0_i32_0 = arith.constant 0 : i32
    %c0_i32_1 = arith.constant 0 : i32
    return %c0_i32, %c0_i32_0 : i32, i32
  }
  func.func @transform_4(%arg0: i32) -> (i32, i32) {
    %c0_i32 = arith.constant 0 : i32
    %c0_i32_0 = arith.constant 0 : i32
    %c0_i32_1 = arith.constant 0 : i32
    return %c0_i32, %c0_i32_0 : i32, i32
  }
  func.func @transform_5(%arg0: i32) -> (i32, i32) {
    %c0_i32 = arith.constant 0 : i32
    %c0_i32_0 = arith.constant 0 : i32
    %c0_i32_1 = arith.constant 0 : i32
    return %c0_i32, %c0_i32_0 : i32, i32
  }
  func.func @transform_6(%arg0: i32) -> (i32, i32) {
    %c0_i32 = arith.constant 0 : i32
    %c0_i32_0 = arith.constant 0 : i32
    %c0_i32_1 = arith.constant 0 : i32
    return %c0_i32, %c0_i32_0 : i32, i32
  }
}

</mosaic_0001>

<bundles_post_ra>
// kernel: tpu_custom_call.1
= control target key start
LH: loop header
LB: loop body
LE: loop exit
PB: predicated region body
PF: predicated region fallthrough
CT: control target
= control target key end

     0   :  { %12 = vsyncpa [#allocation3], 0  ;;  %v1123_v7 = vmov 0.0   ;;  %vm69_vm0 = vcmask 261120   ;;  %s1364_s0 = inlined_call_operand.vmem [shape: f32[128,32], index: 0, kind: input, shape index: {}]   ;;  %s1365_s1 = inlined_call_operand.vmem [shape: f32[32,384], index: 1, kind: input, shape index: {}]   ;;  %s1366_s2 = inlined_call_operand.vmem [shape: f32[1,384], index: 2, kind: input, shape index: {}]   ;;  %s1367_s3 = inlined_call_operand.vmem [shape: f32[16,128], index: 3, kind: input, shape index: {}]   ;;  %s1368_s4 = inlined_call_operand.vmem [shape: f32[16,128], index: 4, kind: input, shape index: {}]   ;;  %s1369_s5 = inlined_call_operand.hbm [shape: f32[16,128], index: 5, kind: output, shape index: {0}]   ;;  %s1370_s6 = inlined_call_operand.hbm [shape: f32[16,128], index: 6, kind: output, shape index: {1}]  }
   0x1   :  { %v41_v0 = vld [vmem:[%s1365_s1 + $0x8] sm:$0xff]  ;;  %v44_v1 = vld [vmem:[%s1365_s1 + $0x20] sm:$0xff]  ;;  %v43_v4 = vld [vmem:[%s1365_s1 + $0x18] sm:$0xff]  ;;  %182 = vmatprep.mubr.f32.mxu0 %v1123_v7 }
   0x2   :  { %v40_v2 = vld [vmem:[%s1365_s1] sm:$0xff]  ;;  %v950_v3 = vpack.c.bf16 %v44_v1, %v41_v0  ;;  %v47_v5 = vld [vmem:[%s1365_s1 + $0x38] sm:$0xff]  ;;  %v50_v6 = vld [vmem:[%s1365_s1 + $0x50] sm:$0xff] }
   0x3   :  { %v952_v8 = vpack.c.bf16 %v43_v4, %v40_v2  ;;  %v954_v9 = vpack.c.bf16 %v50_v6, %v47_v5  ;;  %v46_v10 = vld [vmem:[%s1365_s1 + $0x30] sm:$0xff]  ;;  %v49_v11 = vld [vmem:[%s1365_s1 + $0x48] sm:$0xff]  ;;  %v24_v12 = vld [vmem:[%s1364_s0] sm:$0xff] }
   0x4   :  { %951 = vmatprep.subr.bf16.mxu0 %v950_v3  ;;  %821 = vmatprep.mubr.msk.f32.mxu1 %vm69_vm0, %v24_v12  ;;  %v956_v13 = vpack.c.bf16 %v49_v11, %v46_v10 }
   0x5   :  { %953 = vmatpush1.bf16.msra.mxu0 %v952_v8 }
   0x6   :  { %955 = vmatprep.subr.bf16.mxu0 %v954_v9 }
   0x9   :  { %957 = vmatpush1.bf16.msra.mxu0 %v956_v13 }
   0xa   :  { %13 = vsyncpa [#allocation5], 0  ;;  %v25_v14 = vld [vmem:[%s1364_s0 + $0x8] sm:$0xff]  ;;  %v26_v15 = vld [vmem:[%s1364_s0 + $0x10] sm:$0xff]  ;;  %v54_v36 = vlaneseq }
   0xb   :  { %v27_v16 = vld [vmem:[%s1364_s0 + $0x18] sm:$0xff]  ;;  %v28_v17 = vld [vmem:[%s1364_s0 + $0x20] sm:$0xff]  ;;  %v29_v18 = vld [vmem:[%s1364_s0 + $0x28] sm:$0xff] }
   0xc   :  { %707 = vmatmul.mubr.msk.f32.vlgmr.msra.gmra.mrb[0].mxu0 %vm69_vm0, %v24_v12  ;;  %v30_v19 = vld [vmem:[%s1364_s0 + $0x30] sm:$0xff]  ;;  %v31_v20 = vld [vmem:[%s1364_s0 + $0x38] sm:$0xff]  ;;  %v32_v21 = vld [vmem:[%s1364_s0 + $0x40] sm:$0xff]  ;;  %v1282_v37 = vshrl.u32 %v54_v36, 7 }
   0xd   :  { %188 = vmatprep.mubr.f32.mxu0 %v1123_v7  ;;  %v33_v22 = vld [vmem:[%s1364_s0 + $0x48] sm:$0xff]  ;;  %v34_v23 = vld [vmem:[%s1364_s0 + $0x50] sm:$0xff]  ;;  %v35_v24 = vld [vmem:[%s1364_s0 + $0x58] sm:$0xff] }
   0xe   :  { %v36_v25 = vld [vmem:[%s1364_s0 + $0x60] sm:$0xff]  ;;  %v37_v26 = vld [vmem:[%s1364_s0 + $0x68] sm:$0xff]  ;;  %v38_v27 = vld [vmem:[%s1364_s0 + $0x70] sm:$0xff]  ;;  %v56_v38 = vsub.s32 0, %v1282_v37  ;;  %v60_v40 = vsub.s32 1, %v1282_v37 }
   0xf   :  { %v39_v28 = vld [vmem:[%s1364_s0 + $0x78] sm:$0xff]  ;;  %v42_v29 = vld [vmem:[%s1365_s1 + $0x10] sm:$0xff]  ;;  %v45_v30 = vld [vmem:[%s1365_s1 + $0x28] sm:$0xff] }
  0x10   :  { %708 = vmatmul.mubr.msk.f32.gmra.mrb[2].mxu0 %vm69_vm0, %v25_v14  ;;  %v958_v31 = vpack.c.bf16 %v45_v30, %v42_v29  ;;  %v48_v32 = vld [vmem:[%s1365_s1 + $0x40] sm:$0xff]  ;;  %v51_v33 = vld [vmem:[%s1365_s1 + $0x58] sm:$0xff] }
  0x11   :  { %194 = vmatprep.mubr.f32.mxu0 %v1123_v7  ;;  %v962_v34 = vpack.c.bf16 %v51_v33, %v48_v32  ;;  %v424_v35 = vld [vmem:[%s1367_s3] sm:$0xff] }
  0x12   :  { %959 = vmatprep.subr.bf16.mxu1 %v958_v31  ;;  %v1288_v39 = vld [vmem:[%s1366_s2] sm:$0x7] }
  0x13   :  { %961 = vmatpush3.bf16.msra.mxu1 %v958_v31  ;;  %v1292_v42 = vrot.slane %v1288_v39, %v56_v38  ;;  %v1295_v44 = vrot.slane %v1288_v39, %v60_v40 }
  0x14   :  { %709 = vmatmul.mubr.msk.f32.gmra.mrb[4].mxu0 %vm69_vm0, %v26_v15  ;;  %963 = vmatprep.subr.bf16.mxu1 %v962_v34 }
  0x15   :  { %200 = vmatprep.mubr.f32.mxu0 %v1123_v7 }
  0x17   :  { %965 = vmatpush3.bf16.msra.mxu1 %v962_v34 }
  0x18   :  { %710 = vmatmul.mubr.msk.f32.gmra.mrb[6].mxu0 %vm69_vm0, %v27_v16 }
  0x19   :  { %206 = vmatprep.mubr.f32.mxu0 %v1123_v7 }
  0x1a   :  { %822 = vmatmul.mubr.msk.f32.vlgmr.msra.gmra.mrb[0].mxu1 %vm69_vm0, %v25_v14 }
  0x1b   :  { %824 = vmatprep.mubr.msk.f32.mxu1 %vm69_vm0, %v26_v15 }
  0x1c   :  { %711 = vmatmul.mubr.msk.f32.gmra.mrb[8].mxu0 %vm69_vm0, %v28_v17 }
  0x1d   :  { %212 = vmatprep.mubr.f32.mxu0 %v1123_v7 }
  0x1e   :  { %825 = vmatmul.mubr.msk.f32.gmra.mrb[2].mxu1 %vm69_vm0, %v27_v16 }
  0x1f   :  { %827 = vmatprep.mubr.msk.f32.mxu1 %vm69_vm0, %v28_v17 }
  0x20   :  { %712 = vmatmul.mubr.msk.f32.gmra.mrb[10].mxu0 %vm69_vm0, %v29_v18 }
  0x21   :  { %218 = vmatprep.mubr.f32.mxu0 %v1123_v7 }
  0x22   :  { %828 = vmatmul.mubr.msk.f32.gmra.mrb[4].mxu1 %vm69_vm0, %v29_v18 }
  0x23   :  { %830 = vmatprep.mubr.msk.f32.mxu1 %vm69_vm0, %v30_v19 }
  0x24   :  { %713 = vmatmul.mubr.msk.f32.gmra.mrb[12].mxu0 %vm69_vm0, %v30_v19 }
  0x25   :  { %224 = vmatprep.mubr.f32.mxu0 %v1123_v7 }
  0x26   :  { %831 = vmatmul.mubr.msk.f32.gmra.mrb[6].mxu1 %vm69_vm0, %v31_v20 }
  0x27   :  { %833 = vmatprep.mubr.msk.f32.mxu1 %vm69_vm0, %v32_v21 }
  0x28   :  { %714 = vmatmul.mubr.msk.f32.gmra.mrb[14].mxu0 %vm69_vm0, %v31_v20 }
  0x29   :  { %230 = vmatprep.mubr.f32.mxu0 %v1123_v7 }
  0x2a   :  { %834 = vmatmul.mubr.msk.f32.gmra.mrb[8].mxu1 %vm69_vm0, %v33_v22 }
  0x2b   :  { %836 = vmatprep.mubr.msk.f32.mxu1 %vm69_vm0, %v34_v23 }
  0x2c   :  { %715 = vmatmul.mubr.msk.f32.gmra.mrb[16].mxu0 %vm69_vm0, %v32_v21 }
  0x2d   :  { %236 = vmatprep.mubr.f32.mxu0 %v1123_v7 }
  0x2e   :  { %837 = vmatmul.mubr.msk.f32.gmra.mrb[10].mxu1 %vm69_vm0, %v35_v24 }
  0x2f   :  { %839 = vmatprep.mubr.msk.f32.mxu1 %vm69_vm0, %v36_v25 }
  0x30   :  { %716 = vmatmul.mubr.msk.f32.gmra.mrb[18].mxu0 %vm69_vm0, %v33_v22 }
  0x31   :  { %242 = vmatprep.mubr.f32.mxu0 %v1123_v7 }
  0x32   :  { %840 = vmatmul.mubr.msk.f32.gmra.mrb[12].mxu1 %vm69_vm0, %v37_v26 }
  0x33   :  { %842 = vmatprep.mubr.msk.f32.mxu1 %vm69_vm0, %v38_v27 }
  0x34   :  { %717 = vmatmul.mubr.msk.f32.gmra.mrb[20].mxu0 %vm69_vm0, %v34_v23 }
  0x35   :  { %248 = vmatprep.mubr.f32.mxu0 %v1123_v7 }
  0x36   :  { %843 = vmatmul.mubr.msk.f32.gmra.mrb[14].mxu1 %vm69_vm0, %v39_v28 }
  0x37   :  { %877 = vmatprep.mubr.f32.mxu1 %v424_v35 }
  0x38   :  { %718 = vmatmul.mubr.msk.f32.gmra.mrb[22].mxu0 %vm69_vm0, %v35_v24 }
  0x39   :  { %254 = vmatprep.mubr.f32.mxu0 %v1123_v7 }
  0x3c   :  { %719 = vmatmul.mubr.msk.f32.gmra.mrb[24].mxu0 %vm69_vm0, %v36_v25 }
  0x3d   :  { %260 = vmatprep.mubr.f32.mxu0 %v1123_v7 }
  0x40   :  { %720 = vmatmul.mubr.msk.f32.gmra.mrb[26].mxu0 %vm69_vm0, %v37_v26 }
  0x41   :  { %266 = vmatprep.mubr.f32.mxu0 %v1123_v7 }
  0x44   :  { %721 = vmatmul.mubr.msk.f32.gmra.mrb[28].mxu0 %vm69_vm0, %v38_v27 }
  0x45   :  { %272 = vmatprep.mubr.f32.mxu0 %v1123_v7 }
  0x48   :  { %722 = vmatmul.mubr.msk.f32.gmra.mrb[30].mxu0 %vm69_vm0, %v39_v28 }
  0xdf   :  { %v184_v41 = vpop.f32.mrb[0].mxu0 }
  0xe0   :  { %v186_v43 = vpop.f32.mrb[1].mxu0  ;;  %v185_v46 = vadd.f32 %v184_v41, %v1292_v42 }
  0xe1   :  { %v187_v49 = vadd.f32 %v186_v43, %v1295_v44 }
  0xe3   :  { %v190_v45 = vpop.f32.mrb[2].mxu0 }
  0xe4   :  { %v191_v47 = vadd.f32 %v190_v45, %v1292_v42  ;;  %v192_v48 = vpop.f32.mrb[3].mxu0 }
  0xe5   :  { %v193_v50 = vadd.f32 %v192_v48, %v1295_v44 }
  0xe6   :  { %v998_v51 = vpack.c.bf16 %v191_v47, %v185_v46 }
  0xe7   :  { %v966_v52 = vpack.c.bf16 %v193_v50, %v187_v49  ;;  %v196_v53 = vpop.f32.mrb[4].mxu0 }
  0xe8   :  { %v198_v54 = vpop.f32.mrb[5].mxu0  ;;  %999 = vmatprep.subr.bf16.mxu0 %v998_v51  ;;  %v197_v56 = vadd.f32 %v196_v53, %v1292_v42 }
  0xe9   :  { %967 = vmatprep.subr.bf16.mxu1 %v966_v52  ;;  %1001 = vmatpush3.bf16.xpose.msra.mxu0 %v998_v51  ;;  %v199_v59 = vadd.f32 %v198_v54, %v1295_v44 }
  0xea   :  { %969 = vmatpush3.bf16.msra.mxu1 %v966_v52 }
  0xeb   :  { %v202_v55 = vpop.f32.mrb[6].mxu0 }
  0xec   :  { %v203_v57 = vadd.f32 %v202_v55, %v1292_v42  ;;  %v204_v58 = vpop.f32.mrb[7].mxu0 }
  0xed   :  { %v205_v60 = vadd.f32 %v204_v58, %v1295_v44 }
  0xee   :  { %v1002_v61 = vpack.c.bf16 %v203_v57, %v197_v56 }
  0xef   :  { %v970_v62 = vpack.c.bf16 %v205_v60, %v199_v59  ;;  %v208_v63 = vpop.f32.mrb[8].mxu0 }
  0xf0   :  { %v210_v0 = vpop.f32.mrb[9].mxu0  ;;  %1003 = vmatprep.subr.bf16.mxu0 %v1002_v61  ;;  %v209_v2 = vadd.f32 %v208_v63, %v1292_v42  ;;  %v425_v63 = vld [vmem:[%s1367_s3 + $0x8] sm:$0xff] }
  0xf1   :  { %971 = vmatprep.subr.bf16.mxu1 %v970_v62  ;;  %1005 = vmatpush3.bf16.xpose.msra.mxu0 %v1002_v61  ;;  %v211_v5 = vadd.f32 %v210_v0, %v1295_v44  ;;  %v64_v0 = vsub.s32 2, %v1282_v37 }
  0xf2   :  { %973 = vmatpush3.bf16.msra.mxu1 %v970_v62 }
  0xf3   :  { %v214_v1 = vpop.f32.mrb[10].mxu0 }
  0xf4   :  { %v215_v3 = vadd.f32 %v214_v1, %v1292_v42  ;;  %v216_v4 = vpop.f32.mrb[11].mxu0  ;;  %v823_v1 = vpop.f32.mrb[0].mxu1 }
  0xf5   :  { %v217_v6 = vadd.f32 %v216_v4, %v1295_v44 }
  0xf6   :  { %v1006_v7 = vpack.c.bf16 %v215_v3, %v209_v2  ;;  %v345_v3 = vpop.f32.mrb[1].mxu1 }
  0xf7   :  { %v974_v8 = vpack.c.bf16 %v217_v6, %v211_v5  ;;  %v220_v9 = vpop.f32.mrb[12].mxu0  ;;  %v826_v5 = vpop.f32.mrb[2].mxu1 }
  0xf8   :  { %v222_v10 = vpop.f32.mrb[13].mxu0  ;;  %1007 = vmatprep.subr.bf16.mxu0 %v1006_v7  ;;  %v221_v12 = vadd.f32 %v220_v9, %v1292_v42 }
  0xf9   :  { %975 = vmatprep.subr.bf16.mxu1 %v974_v8  ;;  %1009 = vmatpush3.bf16.xpose.msra.mxu0 %v1006_v7  ;;  %v223_v15 = vadd.f32 %v222_v10, %v1295_v44  ;;  %v355_v7 = vpop.f32.mrb[3].mxu1 }
  0xfa   :  { %977 = vmatpush3.bf16.msra.mxu1 %v974_v8  ;;  %v829_v10 = vpop.f32.mrb[4].mxu1 }
  0xfb   :  { %v226_v11 = vpop.f32.mrb[14].mxu0 }
  0xfc   :  { %v227_v13 = vadd.f32 %v226_v11, %v1292_v42  ;;  %v228_v14 = vpop.f32.mrb[15].mxu0 }
  0xfd   :  { %v229_v16 = vadd.f32 %v228_v14, %v1295_v44 }
  0xfe   :  { %v1010_v17 = vpack.c.bf16 %v227_v13, %v221_v12  ;;  %v365_v12 = vpop.f32.mrb[5].mxu1 }
  0xff   :  { %v978_v18 = vpack.c.bf16 %v229_v16, %v223_v15  ;;  %v232_v19 = vpop.f32.mrb[16].mxu0 }
 0x100   :  { %v234_v20 = vpop.f32.mrb[17].mxu0  ;;  %1011 = vmatprep.subr.bf16.mxu0 %v1010_v17  ;;  %v233_v22 = vadd.f32 %v232_v19, %v1292_v42 }
 0x101   :  { %979 = vmatprep.subr.bf16.mxu1 %v978_v18  ;;  %1013 = vmatpush3.bf16.xpose.msra.mxu0 %v1010_v17  ;;  %v235_v25 = vadd.f32 %v234_v20, %v1295_v44 }
 0x102   :  { %981 = vmatpush3.bf16.msra.mxu1 %v978_v18 }
 0x103   :  { %v238_v21 = vpop.f32.mrb[18].mxu0 }
 0x104   :  { %v239_v23 = vadd.f32 %v238_v21, %v1292_v42  ;;  %v240_v24 = vpop.f32.mrb[19].mxu0 }
 0x105   :  { %v241_v26 = vadd.f32 %v240_v24, %v1295_v44 }
 0x106   :  { %v1014_v27 = vpack.c.bf16 %v239_v23, %v233_v22 }
 0x107   :  { %v982_v28 = vpack.c.bf16 %v241_v26, %v235_v25  ;;  %v244_v29 = vpop.f32.mrb[20].mxu0 }
 0x108   :  { %v246_v30 = vpop.f32.mrb[21].mxu0  ;;  %1015 = vmatprep.subr.bf16.mxu0 %v1014_v27  ;;  %v245_v32 = vadd.f32 %v244_v29, %v1292_v42 }
 0x109   :  { %983 = vmatprep.subr.bf16.mxu1 %v982_v28  ;;  %1017 = vmatpush3.bf16.xpose.msra.mxu0 %v1014_v27  ;;  %v247_v35 = vadd.f32 %v246_v30, %v1295_v44 }
 0x10a   :  { %985 = vmatpush3.bf16.msra.mxu1 %v982_v28 }
 0x10b   :  { %v250_v31 = vpop.f32.mrb[22].mxu0 }
 0x10c   :  { %v251_v33 = vadd.f32 %v250_v31, %v1292_v42  ;;  %v252_v34 = vpop.f32.mrb[23].mxu0 }
 0x10d   :  { %v253_v36 = vadd.f32 %v252_v34, %v1295_v44 }
 0x10e   :  { %v1018_v38 = vpack.c.bf16 %v251_v33, %v245_v32 }
 0x10f   :  { %v986_v40 = vpack.c.bf16 %v253_v36, %v247_v35  ;;  %v256_v41 = vpop.f32.mrb[24].mxu0 }
 0x110   :  { %v258_v43 = vpop.f32.mrb[25].mxu0  ;;  %1019 = vmatprep.subr.bf16.mxu0 %v1018_v38  ;;  %v257_v46 = vadd.f32 %v256_v41, %v1292_v42 }
 0x111   :  { %987 = vmatprep.subr.bf16.mxu1 %v986_v40  ;;  %1021 = vmatpush3.bf16.xpose.msra.mxu0 %v1018_v38  ;;  %v259_v49 = vadd.f32 %v258_v43, %v1295_v44  ;;  %v501_v43 = vld [vmem:[%s1368_s4] sm:$0xff] }
 0x112   :  { %989 = vmatpush3.bf16.msra.mxu1 %v986_v40 }
 0x113   :  { %v262_v45 = vpop.f32.mrb[26].mxu0 }
 0x114   :  { %v263_v47 = vadd.f32 %v262_v45, %v1292_v42  ;;  %v264_v48 = vpop.f32.mrb[27].mxu0 }
 0x115   :  { %v265_v50 = vadd.f32 %v264_v48, %v1295_v44  ;;  %v502_v48 = vld [vmem:[%s1368_s4 + $0x8] sm:$0xff]  ;;  %s1124_s4 = smov [#allocation4]  }
 0x116   :  { %v1022_v51 = vpack.c.bf16 %v263_v47, %v257_v46  ;;  %s692_s11 = sshll.u32 %s1124_s4, 4  ;;  %s693_s11 = int_to_ptr.vmem [resolvable:$true] %s692_s11 }
 0x117   :  { %v990_v52 = vpack.c.bf16 %v265_v50, %v259_v49  ;;  %v268_v53 = vpop.f32.mrb[28].mxu0  ;;  %s1075_s12 = scalar_lea.vmem %s693_s11, 256  ;;  %p1080_p1 = scmp.lt.s32.totalorder %s693_s11, %s693_s11 }
 0x118   :  { %v270_v54 = vpop.f32.mrb[29].mxu0  ;;  %1023 = vmatprep.subr.bf16.mxu0 %v1022_v51  ;;  %v269_v56 = vadd.f32 %v268_v53, %v1292_v42  ;;  %p1076_p0 = scmp.ne.s32.totalorder %s693_s11, %s1075_s12  ;;  %p1081_p2 = scmp.lt.s32.totalorder %s1075_s12, %s1075_s12 }
 0x119   :  { %991 = vmatprep.subr.bf16.mxu1 %v990_v52  ;;  %1025 = vmatpush3.bf16.xpose.msra.mxu0 %v1022_v51  ;;  %v271_v59 = vadd.f32 %v270_v54, %v1295_v44 }
 0x11a   :  { %993 = vmatpush3.bf16.msra.mxu1 %v990_v52  ;;  %p1082_p3 = por %p1081_p2, %p1080_p1 }
 0x11b   :  { %v274_v55 = vpop.f32.mrb[30].mxu0 }
 0x11c   :  { %v275_v57 = vadd.f32 %v274_v55, %v1292_v42  ;;  %v276_v58 = vpop.f32.mrb[31].mxu0  ;;  %v65_v42 = vrot.slane %v1288_v39, %v64_v0  ;;  %v832_v39 = vpop.f32.mrb[6].mxu1  ;;  %p1083_p4 = pnand %p1082_p3, %p1076_p0 }
 0x11d   :  { %v277_v60 = vadd.f32 %v276_v58, %v1295_v44  ;;  %v375_v15 = vpop.f32.mrb[7].mxu1 }
 0x11e   :  { %v1026_v61 = vpack.c.bf16 %v275_v57, %v269_v56  ;;  %v351_v2 = vadd.f32 %v823_v1, %v65_v42  ;;  %v346_v4 = vadd.f32 %v345_v3, %v65_v42  ;;  %v361_v6 = vadd.f32 %v826_v5, %v65_v42  ;;  %v835_v18 = vpop.f32.mrb[8].mxu1 }
 0x11f   :  { %v994_v62 = vpack.c.bf16 %v277_v60, %v271_v59  ;;  %v356_v8 = vadd.f32 %v355_v7, %v65_v42  ;;  %v371_v11 = vadd.f32 %v829_v10, %v65_v42  ;;  %v366_v13 = vadd.f32 %v365_v12, %v65_v42  ;;  %v385_v20 = vpop.f32.mrb[9].mxu1 }
 0x120   :  { %1027 = vmatprep.subr.bf16.mxu0 %v1026_v61  ;;  %v1030_v44 = vpack.c.bf16 %v351_v2, %v346_v4  ;;  %v381_v14 = vadd.f32 %v832_v39, %v65_v42  ;;  %v376_v16 = vadd.f32 %v375_v15, %v65_v42  ;;  %v391_v19 = vadd.f32 %v835_v18, %v65_v42  ;;  %v838_v23 = vpop.f32.mrb[10].mxu1 }
 0x121   :  { %995 = vmatprep.subr.bf16.mxu1 %v994_v62  ;;  %1029 = vmatpush3.bf16.xpose.msra.mxu0 %v1026_v61  ;;  %v1034_v9 = vpack.c.bf16 %v361_v6, %v356_v8  ;;  %v1038_v37 = vpack.c.bf16 %v371_v11, %v366_v13  ;;  %v386_v21 = vadd.f32 %v385_v20, %v65_v42  ;;  %v395_v25 = vpop.f32.mrb[11].mxu1 }
 0x122   :  { %997 = vmatpush3.bf16.msra.mxu1 %v994_v62  ;;  %v1042_v17 = vpack.c.bf16 %v381_v14, %v376_v16  ;;  %v401_v24 = vadd.f32 %v838_v23, %v65_v42  ;;  %v396_v26 = vadd.f32 %v395_v25, %v65_v42  ;;  %v841_v28 = vpop.f32.mrb[12].mxu1 }
 0x123   :  { %1031 = vmatprep.subr.bf16.mxu1 %v1030_v44  ;;  %v1046_v22 = vpack.c.bf16 %v391_v19, %v386_v21  ;;  %v411_v29 = vadd.f32 %v841_v28, %v65_v42  ;;  %v405_v30 = vpop.f32.mrb[13].mxu1 }
 0x124   :  { %v1050_v27 = vpack.c.bf16 %v401_v24, %v396_v26  ;;  %v406_v31 = vadd.f32 %v405_v30, %v65_v42  ;;  %v844_v33 = vpop.f32.mrb[14].mxu1 }
 0x125   :  { %878 = vmatmul.mubr.f32.vlgmr.msra.gmra.mrb[16].mxu1 %v425_v63  ;;  %v421_v34 = vadd.f32 %v844_v33, %v65_v42  ;;  %v415_v35 = vpop.f32.mrb[15].mxu1 }
 0x126   :  { %1033 = vmatpush3.bf16.msra.mxu1 %v1030_v44  ;;  %v1054_v32 = vpack.c.bf16 %v411_v29, %v406_v31  ;;  %v416_v36 = vadd.f32 %v415_v35, %v65_v42 }
 0x127   :  { %1035 = vmatprep.subr.bf16.mxu1 %v1034_v9 }
 0x128   :  { %v1058_v38 = vpack.c.bf16 %v421_v34, %v416_v36 }
 0x12a   :  { %1037 = vmatpush3.bf16.msra.mxu1 %v1034_v9 }
 0x12b   :  { %1039 = vmatprep.subr.bf16.mxu1 %v1038_v37 }
 0x12e   :  { %1041 = vmatpush3.bf16.msra.mxu1 %v1038_v37 }
 0x12f   :  { %1043 = vmatprep.subr.bf16.mxu1 %v1042_v17 }
 0x132   :  { %1045 = vmatpush3.bf16.msra.mxu1 %v1042_v17 }
 0x133   :  { %1047 = vmatprep.subr.bf16.mxu1 %v1046_v22 }
 0x136   :  { %1049 = vmatpush3.bf16.msra.mxu1 %v1046_v22 }
 0x137   :  { %1051 = vmatprep.subr.bf16.mxu1 %v1050_v27 }
 0x13a   :  { %1053 = vmatpush3.bf16.msra.mxu1 %v1050_v27 }
 0x13b   :  { %1055 = vmatprep.subr.bf16.mxu1 %v1054_v32 }
 0x13e   :  { %1057 = vmatpush3.bf16.msra.mxu1 %v1054_v32 }
 0x13f   :  { %1059 = vmatprep.subr.bf16.mxu1 %v1058_v38 }
 0x142   :  { %1061 = vmatpush3.bf16.msra.mxu1 %v1058_v38 }
 0x1f8   :  { %v879_v40 = vpop.f32.mrb[16].mxu1 }
 0x1f9   :  { %v492_v41 = vpop.f32.mrb[17].mxu1 }
 0x1fa   :  { %912 = vmatprep.mubr.f32.mxu0 %v492_v41 }
 0x1fb   :  { %913 = vmatmul.mubr.f32.vlgmr.msra.gmra.mrb[32].mxu0 %v879_v40 }
 0x2ce   :  { %v914_v45 = vpop.f32.mrb[32].mxu0 }
 0x2cf   :  { %v569_v46 = vpop.f32.mrb[33].mxu0  ;;  %v575_v49 = vadd.f32 %v914_v45, %v502_v48 }
 0x2d0   :  { %v570_v47 = vadd.f32 %v569_v46, %v501_v43 }
 0x2d2   :  { %578 = vmax.xlane.f32.xlu0 %v570_v47 }
 0x2d6   :  { %580 = vmax.xlane.f32.xlu0 %v575_v49 }
 0x35f   :  { %v579_v50 = vpop.xlane.xlu0 %578 }
 0x360   :  { %v582_v51 = vsub.f32 %v570_v47, %v579_v50 }
 0x362   :  { %v584_v52 = vmul.f32 1.442695, %v582_v51 }
 0x363   :  { %v581_v53 = vpop.xlane.xlu0 %580 }
 0x364   :  { %1067 = vpow2.f32 %v584_v52  ;;  %v583_v54 = vsub.f32 %v575_v49, %v581_v53 }
 0x366   :  { %v586_v55 = vmul.f32 1.442695, %v583_v54 }
 0x368   :  { %1069 = vpow2.f32 %v586_v55 }
 0x36e   :  { %v1068_v56 = vpop.eup %1067 }
 0x36f   :  { %588 = vadd.xlane.f32.xlu1 %v1068_v56 }
 0x372   :  { %v1070_v57 = vpop.eup %1069 }
 0x373   :  { %590 = vadd.xlane.f32.xlu1 %v1070_v57 }
 0x3fc   :  { %v589_v58 = vpop.xlane.xlu1 %588 }
 0x3fd   :  { %1071 = vrcp.f32 %v589_v58 }
 0x400   :  { %v591_v59 = vpop.xlane.xlu1 %590 }
 0x401   :  { %1073 = vrcp.f32 %v591_v59 }
 0x407   :  { %v1072_v60 = vpop.eup %1071 }
 0x408   :  { %v594_v61 = vmul.f32 %v1072_v60, %v1068_v56 }
 0x40a   :  { %596 = vst [vmem:[#allocation4] sm:$0xff] %v594_v61  ;;  %947 = vmatprep.mubr.f32.mxu1 %v594_v61 }
 0x40b   :  { %v1074_v62 = vpop.eup %1073 }
 0x40c   :  { %v595_v63 = vmul.f32 %v1074_v62, %v1070_v57 }
 0x40e   :  { %948 = vmatmul.mubr.f32.vlgmr.msra.gmra.mrb[18].mxu1 %v595_v63  ;;  %597 = vst [vmem:[#allocation4 + $0x8] sm:$0xff] %v595_v63 }
 0x40f   :  { %1086 = shalt.err (!%p1083_p4)
}
 0x410   :  { %s1087_s15 = scalar_lea.hbm %s1370_s6, 256 }
 0x411   :  { %p1088_p5 = scmp.ne.s32.totalorder %s1370_s6, %s1087_s15  ;;  %p1091_p6 = scmp.lt.u32.totalorder %s1087_s15, %s1370_s6 }
 0x413   :  { %p1093_p7 = pnand %p1091_p6, %p1088_p5 }
 0x415   :  { %1096 = shalt.err (!%p1093_p7)
}
 0x416   :  { %s1125_s20 = smov 128   ;;  %s1126_s21 = smov 8  }
 0x417   :  { %698 = dma.vmem_to_hbm [thread:$0]  %s693_s11, 256, %s1370_s6, [#allocation5], %s1125_s20, %s1125_s20, %s1126_s21  }
 0x418   :  { %s1127_s24 = smov [#allocation2]  }
 0x419   :  { %s680_s25 = sshll.u32 %s1127_s24, 4  ;;  %s681_s25 = int_to_ptr.vmem [resolvable:$true] %s680_s25 }
 0x41a   :  { %s1097_s26 = scalar_lea.vmem %s681_s25, 256  ;;  %p1102_p9 = scmp.lt.s32.totalorder %s681_s25, %s681_s25 }
 0x41b   :  { %p1098_p8 = scmp.ne.s32.totalorder %s681_s25, %s1097_s26  ;;  %p1103_p10 = scmp.lt.s32.totalorder %s1097_s26, %s1097_s26 }
 0x41d   :  { %p1104_p11 = por %p1103_p10, %p1102_p9 }
 0x41f   :  { %p1105_p12 = pnand %p1104_p11, %p1098_p8 }
 0x4e1   :  { %v949_v0 = vpop.f32.mrb[18].mxu1 }
 0x4e2   :  { %674 = vst [vmem:[#allocation2 + $0x8] sm:$0xff] %v949_v0  ;;  %v664_v42 = vpop.f32.mrb[19].mxu1 }
 0x4e3   :  { %673 = vst [vmem:[#allocation2] sm:$0xff] %v664_v42 }
 0x4e4   :  { %1108 = shalt.err (!%p1105_p12)
}
 0x4e5   :  { %s1109_s0 = scalar_lea.hbm %s1369_s5, 256 }
 0x4e6   :  { %p1110_p13 = scmp.ne.s32.totalorder %s1369_s5, %s1109_s0  ;;  %p1113_p0 = scmp.lt.u32.totalorder %s1109_s0, %s1369_s5 }
 0x4e8   :  { %p1115_p1 = pnand %p1113_p0, %p1110_p13 }
 0x4ea   :  { %1118 = shalt.err (!%p1115_p1)
}
 0x4eb   :  { %686 = dma.vmem_to_hbm [thread:$0]  %s681_s25, 256, %s1369_s5, [#allocation3], %s1125_s20, %s1125_s20, %s1126_s21  }
 0x4ec   :  { %1119 = dma.done.wait [#allocation3], 256  }
 0x4ed   :  { %1120 = vsyncadd [#allocation3], 4294967040 }
 0x4ee   :  { %1121 = dma.done.wait [#allocation5], 256  }
 0x4ef   :  { %1122 = vsyncadd [#allocation5], 4294967040 }
 0x4f0   :  { %705 = vsyncpa [#allocation3], 1 }
 0x4f1   :  { %706 = vsyncpa [#allocation5], 1 }

</bundles_post_ra>
